<compile_context>
chip_gen: v6e
topology: v6e:2x2x1
jax: 0.10.0
libtpu: 0.0.40
codegen_flags: <defaults>
</compile_context>

<pallas_src>
import functools
import math

import jax
import jax.numpy as jnp
from jax.experimental import pallas as pl
from jax.experimental.pallas import tpu as pltpu

_LANE = 128
_MAX_TN = 32      # sublane rows per block (caps accumulator vreg pressure)
_UNROLL = 4       # fori_loop unroll for long chunk loops


# ----------------------------------------------------------------------------
# tiling helpers
# ----------------------------------------------------------------------------
def _cdiv(a, b):
    return -(-a // b)


def _vmem_capacity_bytes():
    try:
        info = pltpu.get_tpu_info()
        cap = getattr(info, "vmem_capacity_bytes", None)
        if cap:
            return int(cap)
    except Exception:
        pass
    return 64 << 20  # v7x per-TC VMEM; conservative default


def _sublane_pack(dtypes):
    """Sublane rows per vreg for the narrowest streamed dtype (8/16/32)."""
    pack = 8
    for dt in dtypes:
        item = jnp.dtype(dt).itemsize
        if item >= 1:
            pack = max(pack, (4 // item) * 8)
    return pack


def _choose_fold(n, d, pack):
    """Smallest G dividing D with (N*G) sublane-aligned and D/G >= 256."""
    min_dg = min(d, 256)

    def find(align):
        g = 1
        while g <= 64:
            if d % g == 0 and (n * g) % align == 0 and d // g >= min_dg:
                return g
            g += 1
        return None

    for align in (pack, 8):
        g = find(align)
        if g is not None:
            return g
    return 1


def _choose_batch_tile(rows):
    """Largest multiple-of-8 divisor of rows up to _MAX_TN, else full rows."""
    if rows % 8 != 0:
        return rows
    tn, t = 8, 8
    while t <= min(rows, _MAX_TN):
        if rows % t == 0:
            tn = t
        t += 8
    return tn


def _choose_feature_tile(dg, cap_lanes):
    """(td, feat_tiles): td is the full row, an exact 128-multiple divisor of
    dg, or a 128-multiple with a ragged (lane-masked) last tile."""
    if dg <= cap_lanes:
        return dg, 1
    t = cap_lanes
    while t >= max(_LANE, cap_lanes // 2):
        if dg % t == 0:
            return t, dg // t
        t -= _LANE
    return cap_lanes, _cdiv(dg, cap_lanes)


# ----------------------------------------------------------------------------
# kernel (handles masked / unmasked via static flags)
# ----------------------------------------------------------------------------
def _sse_kernel(*refs, dg, td, with_mask, needs_lane_mask, unroll):
    if with_mask:
        x_ref, y_ref, m_ref, sse_ref, cnt_ref = refs
    else:
        x_ref, y_ref, sse_ref = refs
        m_ref = cnt_ref = None

    p = pl.program_id(0)
    k = pl.program_id(2)
    tn = x_ref.shape[0]

    @pl.when(k == 0)
    def _():
        sse_ref[...] = jnp.zeros_like(sse_ref)
        if with_mask:
            cnt_ref[...] = jnp.zeros_like(cnt_ref)

    n_full = td // _LANE
    rem = td - n_full * _LANE
    tile_off = (p * pl.num_programs(2) + k) * td  # global feature offset

    if needs_lane_mask:
        lane = jax.lax.broadcasted_iota(jnp.int32, (tn, _LANE), 1)

    def chunk(j, carry):
        off = j * _LANE
        if not isinstance(off, int):
            off = pl.multiple_of(off, _LANE)
        sl = pl.ds(off, _LANE)
        xc = x_ref[:, sl].astype(jnp.float32)
        yc = y_ref[:, sl].astype(jnp.float32)
        diff = xc - yc
        sq = diff * diff
        if with_mask:
            mc = m_ref[:, sl].astype(jnp.float32)
            sq = sq * mc
        if needs_lane_mask:
            valid = lane < (dg - tile_off - j * _LANE)
            sq = jnp.where(valid, sq, 0.0)   # select drops OOB garbage (even NaN/Inf)
            if with_mask:
                mc = jnp.where(valid, mc, 0.0)
        if with_mask:
            return (carry[0] + sq, carry[1] + mc)
        return (carry[0] + sq,)

    zero = jnp.zeros((tn, _LANE), jnp.float32)
    carry = (zero, zero) if with_mask else (zero,)
    if n_full > 0:
        if n_full <= 8:
            for j in range(n_full):          # short: static unroll
                carry = chunk(j, carry)
        else:                                # long: bounded-unroll fori_loop
            carry = jax.lax.fori_loop(0, n_full, chunk, carry, unroll=unroll)

    sse_ref[...] = sse_ref[...] + carry[0]
    if with_mask:
        cnt_ref[...] = cnt_ref[...] + carry[1]

    if rem:
        # Only reached when td == dg (single full-row tile): no OOB, no mask.
        sl = slice(n_full * _LANE, td)
        xt = x_ref[:, sl].astype(jnp.float32)
        yt = y_ref[:, sl].astype(jnp.float32)
        dt = xt - yt
        if with_mask:
            mt = m_ref[:, sl].astype(jnp.float32)
            sse_ref[:, :rem] = sse_ref[:, :rem] + dt * dt * mt
            cnt_ref[:, :rem] = cnt_ref[:, :rem] + mt
        else:
            sse_ref[:, :rem] = sse_ref[:, :rem] + dt * dt


# ----------------------------------------------------------------------------
# pallas_call wrapper: per-(folded-)row lane-partial SSE (and mask count)
# ----------------------------------------------------------------------------
def _per_row_sse(x2d, y2d, m2d=None, *, max_step_bytes=None):
    rows, dg = x2d.shape
    tn = _choose_batch_tile(rows)
    batch_tiles = rows // tn

    stream_bytes = x2d.dtype.itemsize + y2d.dtype.itemsize
    if m2d is not None:
        stream_bytes += m2d.dtype.itemsize

    vmem_cap = _vmem_capacity_bytes()
    vmem_limit = int(min(vmem_cap * 3 // 4, 100 << 20))
    input_budget = vmem_limit * 3 // 5            # double-buffered input tiles
    step_cap = input_budget // 2                  # streamed bytes per grid step
    step_target = min(step_cap,
                      (8 << 20) if vmem_cap >= (96 << 20) else (4 << 20))
    if max_step_bytes is not None:
        step_target = min(step_target, int(max_step_bytes))
    cap_lanes = max(_LANE,
                    (step_target // (tn * stream_bytes)) // _LANE * _LANE)

    td, feat_tiles = _choose_feature_tile(dg, cap_lanes)

    # Guarantee >=2 blocks along a parallel axis when possible (v7x 2 TCs).
    if batch_tiles >= 2 or feat_tiles < 2:
        nsplit, kpg = 1, feat_tiles
    else:
        nsplit, kpg = 2, _cdiv(feat_tiles, 2)
    clamp_blk = nsplit * kpg != feat_tiles
    needs_lane_mask = (td * feat_tiles != dg) or clamp_blk

    def in_idx(p, i, k):
        t = p * kpg + k
        if clamp_blk:
            t = jnp.minimum(t, feat_tiles - 1)   # phantom tile -> last real tile
        return (i, t)

    in_spec = pl.BlockSpec((tn, td), in_idx)
    out_spec = pl.BlockSpec((None, tn, _LANE), lambda p, i, k: (p, i, 0))
    grid = (nsplit, batch_tiles, kpg)

    cparams = pltpu.CompilerParams(
        dimension_semantics=("parallel", "parallel", "arbitrary"),
        vmem_limit_bytes=vmem_limit,
    )

    with_mask = m2d is not None
    kernel = functools.partial(
        _sse_kernel, dg=dg, td=td, with_mask=with_mask,
        needs_lane_mask=needs_lane_mask, unroll=_UNROLL)

    if not with_mask:
        sse_p = pl.pallas_call(
            kernel,
            out_shape=jax.ShapeDtypeStruct((nsplit, rows, _LANE), jnp.float32),
            grid_spec=pltpu.PrefetchScalarGridSpec(
                num_scalar_prefetch=0,
                grid=grid,
                in_specs=[in_spec, in_spec],
                out_specs=out_spec,
            ),
            compiler_params=cparams,
        )(x2d, y2d)
        return sse_p, None

    sse_p, cnt_p = pl.pallas_call(
        kernel,
        out_shape=(
            jax.ShapeDtypeStruct((nsplit, rows, _LANE), jnp.float32),
            jax.ShapeDtypeStruct((nsplit, rows, _LANE), jnp.float32),
        ),
        grid_spec=pltpu.PrefetchScalarGridSpec(
            num_scalar_prefetch=0,
            grid=grid,
            in_specs=[in_spec, in_spec, in_spec],
            out_specs=[out_spec, out_spec],
        ),
        compiler_params=cparams,
    )(x2d, y2d, m2d)
    return sse_p, cnt_p


# ----------------------------------------------------------------------------
# public op (matches PSNR.forward)
# ----------------------------------------------------------------------------
@functools.partial(jax.jit, static_argnames=("reduction", "max_step_bytes"))
def psnr(inputs, targets, valid_mask=None, reduction="mean", max_step_bytes=None):
    assert reduction in ("mean", "none")
    n = inputs.shape[0]
    d = int(math.prod(inputs.shape[1:]))

    if valid_mask is None:
        pack = _sublane_pack((inputs.dtype, targets.dtype))
        g = _choose_fold(n, d, pack)
        rows, dgl = n * g, d // g
        sse_p, _ = _per_row_sse(inputs.reshape(rows, dgl),
                                targets.reshape(rows, dgl),
                                None, max_step_bytes=max_step_bytes)
        if reduction == "mean":
            mean_val = jnp.sum(sse_p) / jnp.float32(n * d)
            return -10.0 * jnp.log10(mean_val)
        sse = jnp.sum(sse_p, axis=(0, 2)).reshape(n, g).sum(axis=1)
        return -10.0 * jnp.log10(sse / jnp.float32(d))

    m = valid_mask
    if m.dtype != jnp.dtype(jnp.int8):
        m = m.astype(jnp.bool_).astype(jnp.int8)   # 1 B/elem HBM mask traffic
    pack = _sublane_pack((inputs.dtype, targets.dtype, m.dtype))
    g = _choose_fold(n, d, pack)
    rows, dgl = n * g, d // g
    sse_p, cnt_p = _per_row_sse(inputs.reshape(rows, dgl),
                                targets.reshape(rows, dgl),
                                m.reshape(rows, dgl),
                                max_step_bytes=max_step_bytes)
    if reduction == "mean":
        mean_val = jnp.sum(sse_p) / jnp.sum(cnt_p)
        return -10.0 * jnp.log10(mean_val)
    # TODO(synk): torch boolean indexing flattens across the batch, so masked
    # reduction='none' here is a per-sample masked mean; only 'mean' matches
    # torch exactly.
    sse = jnp.sum(sse_p, axis=(0, 2)).reshape(n, g).sum(axis=1)
    cnt = jnp.sum(cnt_p, axis=(0, 2)).reshape(n, g).sum(axis=1)
    return -10.0 * jnp.log10(sse / cnt)


# ----------------------------------------------------------------------------
# reference + self-test
# ----------------------------------------------------------------------------
def _psnr_ref(inputs, targets, valid_mask=None, reduction="mean"):
    value = (inputs - targets) ** 2
    if valid_mask is not None:
        value = value[valid_mask]
    if reduction == "mean":
        return -10.0 * jnp.log10(jnp.mean(value))
    return -10.0 * jnp.log10(jnp.mean(value, axis=tuple(range(value.ndim))[1:]))


if __name__ == "__main__":
    key = jax.random.PRNGKey(0)
    k1, k2, k3, k4, k5 = jax.random.split(key, 5)

    # Case 1: NCHW f32 + boolean mask (batch-fold path, single feature tile).
    shape = (2, 4, 16, 16)
    inputs = jax.random.uniform(k1, shape, dtype=jnp.float32)
    targets = jax.random.uniform(k2, shape, dtype=jnp.float32)
    valid_mask = jax.random.uniform(k3, shape) > 0.3

    out_mean = psnr(inputs, targets, reduction="mean")
    out_none = psnr(inputs, targets, reduction="none")
    out_mask = psnr(inputs, targets, valid_mask=valid_mask, reduction="mean")
    jax.block_until_ready((out_mean, out_none, out_mask))

    assert jnp.allclose(out_mean, _psnr_ref(inputs, targets),
                        rtol=1e-5, atol=1e-5), (out_mean,)
    assert jnp.allclose(out_none, _psnr_ref(inputs, targets, reduction="none"),
                        rtol=1e-5, atol=1e-5), (out_none,)
    assert jnp.allclose(out_mask, _psnr_ref(inputs, targets, valid_mask),
                        rtol=1e-5, atol=1e-5), (out_mask,)

    # Case 2: non-128-aligned feature length (in-kernel remainder chunk).
    shape2 = (1, 3, 40, 40)
    a2 = jax.random.uniform(k4, shape2, dtype=jnp.float32)
    b2 = jax.random.uniform(k5, shape2, dtype=jnp.float32)
    o2 = psnr(a2, b2, reduction="mean")
    o2n = psnr(a2, b2, reduction="none")
    jax.block_until_ready((o2, o2n))
    assert jnp.allclose(o2, _psnr_ref(a2, b2), rtol=1e-5, atol=1e-5), (o2,)
    assert jnp.allclose(o2n, _psnr_ref(a2, b2, reduction="none"),
                        rtol=1e-5, atol=1e-5), (o2n,)

    # Case 3: force multi-tile feature axis + 2-way parallel split + ragged
    # last tile (lane-masked) via a small per-step byte cap.
    shape3 = (1, 1, 80, 80)
    a3 = jax.random.uniform(k1, shape3, dtype=jnp.float32)
    b3 = jax.random.uniform(k2, shape3, dtype=jnp.float32)
    m3 = jax.random.uniform(k3, shape3) > 0.5
    o3 = psnr(a3, b3, reduction="mean", max_step_bytes=16 * 1024)
    o3m = psnr(a3, b3, valid_mask=m3, reduction="mean", max_step_bytes=16 * 1024)
    jax.block_until_ready((o3, o3m))
    assert jnp.allclose(o3, _psnr_ref(a3, b3), rtol=1e-5, atol=1e-5), (o3,)
    assert jnp.allclose(o3m, _psnr_ref(a3, b3, m3), rtol=1e-5, atol=1e-5), (o3m,)

    print("KERNEL_OK")
</pallas_src>

<mosaic_0001>
module attributes {stable_mosaic.version = 11 : i64} {
  func.func @_sse_kernel(%arg0: i32, %arg1: i32, %arg2: i32, %arg3: memref<8x256xf32, #tpu.memory_space<vmem>>, %arg4: memref<8x256xf32, #tpu.memory_space<vmem>>, %arg5: memref<1x8x128xf32, #tpu.memory_space<vmem>>) attributes {dimension_semantics = [#tpu.dimension_semantics<parallel>, #tpu.dimension_semantics<parallel>, #tpu.dimension_semantics<arbitrary>], iteration_bounds = array<i64: 1, 1, 1>, scalar_prefetch = 0 : i64, scratch_operands = 0 : i64, tpu.core_type = #tpu.core_type<tc>, window_params = [{transform_indices = @transform_0, window_bounds = array<i64: 8, 256>}, {transform_indices = @transform_1, window_bounds = array<i64: 8, 256>}, {transform_indices = @transform_2, window_bounds = array<i64: 1, 8, 128>}]} {
    %c0_i32 = arith.constant 0 : i32
    %0 = arith.cmpi eq, %arg2, %c0_i32 : i32
    %1 = arith.extui %0 : i1 to i32
    %c0_i32_0 = arith.constant 0 : i32
    %2 = arith.cmpi ne, %1, %c0_i32_0 : i32
    scf.if %2 {
      %cst_13 = arith.constant 0.000000e+00 : f32
      %20 = vector.broadcast %cst_13 : f32 to vector<8x128xf32>
      %c0_14 = arith.constant 0 : index
      %c0_15 = arith.constant 0 : index
      %c0_16 = arith.constant 0 : index
      %21 = vector.load %arg5[%c0_14, %c0_15, %c0_16] : memref<1x8x128xf32, #tpu.memory_space<vmem>>, vector<1x8x128xf32>
      %22 = vector.shape_cast %21 : vector<1x8x128xf32> to vector<8x128xf32>
      %23 = vector.shape_cast %20 : vector<8x128xf32> to vector<1x8x128xf32>
      tpu.vector_store %arg5[%c0_14, %c0_15, %c0_16], %23 {strides = array<i32>} : memref<1x8x128xf32, #tpu.memory_space<vmem>>, vector<1x8x128xf32>,
    } else {
    }
    %cst = arith.constant 0.000000e+00 : f32
    %3 = vector.broadcast %cst : f32 to vector<8x128xf32>
    %c0 = arith.constant 0 : index
    %c0_1 = arith.constant 0 : index
    %4 = vector.load %arg3[%c0, %c0_1] : memref<8x256xf32, #tpu.memory_space<vmem>>, vector<8x128xf32>
    %c0_2 = arith.constant 0 : index
    %c0_3 = arith.constant 0 : index
    %5 = vector.load %arg4[%c0_2, %c0_3] : memref<8x256xf32, #tpu.memory_space<vmem>>, vector<8x128xf32>
    %6 = arith.subf %4, %5 : vector<8x128xf32>
    %7 = arith.mulf %6, %6 : vector<8x128xf32>
    %8 = arith.addf %3, %7 : vector<8x128xf32>
    %c0_4 = arith.constant 0 : index
    %c128 = arith.constant 128 : index
    %9 = vector.load %arg3[%c0_4, %c128] : memref<8x256xf32, #tpu.memory_space<vmem>>, vector<8x128xf32>
    %c0_5 = arith.constant 0 : index
    %c128_6 = arith.constant 128 : index
    %10 = vector.load %arg4[%c0_5, %c128_6] : memref<8x256xf32, #tpu.memory_space<vmem>>, vector<8x128xf32>
    %11 = arith.subf %9, %10 : vector<8x128xf32>
    %12 = arith.mulf %11, %11 : vector<8x128xf32>
    %13 = arith.addf %8, %12 : vector<8x128xf32>
    %c0_7 = arith.constant 0 : index
    %c0_8 = arith.constant 0 : index
    %c0_9 = arith.constant 0 : index
    %14 = vector.load %arg5[%c0_7, %c0_8, %c0_9] : memref<1x8x128xf32, #tpu.memory_space<vmem>>, vector<1x8x128xf32>
    %15 = vector.shape_cast %14 : vector<1x8x128xf32> to vector<8x128xf32>
    %16 = arith.addf %15, %13 : vector<8x128xf32>
    %c0_10 = arith.constant 0 : index
    %c0_11 = arith.constant 0 : index
    %c0_12 = arith.constant 0 : index
    %17 = vector.load %arg5[%c0_10, %c0_11, %c0_12] : memref<1x8x128xf32, #tpu.memory_space<vmem>>, vector<1x8x128xf32>
    %18 = vector.shape_cast %17 : vector<1x8x128xf32> to vector<8x128xf32>
    %19 = vector.shape_cast %16 : vector<8x128xf32> to vector<1x8x128xf32>
    tpu.vector_store %arg5[%c0_10, %c0_11, %c0_12], %19 {strides = array<i32>} : memref<1x8x128xf32, #tpu.memory_space<vmem>>, vector<1x8x128xf32>,
    return
  }
  func.func @transform_0(%arg0: i32, %arg1: i32, %arg2: i32) -> (i32, i32) {
    %c1_i32 = arith.constant 1 : i32
    %0 = arith.muli %arg0, %c1_i32 : i32
    %1 = arith.addi %0, %arg2 : i32
    %c0_i32 = arith.constant 0 : i32
    return %arg1, %1 : i32, i32
  }
  func.func @transform_1(%arg0: i32, %arg1: i32, %arg2: i32) -> (i32, i32) {
    %c1_i32 = arith.constant 1 : i32
    %0 = arith.muli %arg0, %c1_i32 : i32
    %1 = arith.addi %0, %arg2 : i32
    %c0_i32 = arith.constant 0 : i32
    return %arg1, %1 : i32, i32
  }
  func.func @transform_2(%arg0: i32, %arg1: i32, %arg2: i32) -> (i32, i32, i32) {
    %c0_i32 = arith.constant 0 : i32
    %c0_i32_0 = arith.constant 0 : i32
    return %arg0, %arg1, %c0_i32 : i32, i32, i32
  }
}

</mosaic_0001>

<bundles_post_ra>
// kernel: psnr.1
= control target key start
LH: loop header
LB: loop body
LE: loop exit
PB: predicated region body
PF: predicated region fallthrough
CT: control target
= control target key end

     0   :  { %s120_s0 = inlined_call_operand.vmem [shape: f32[8,256], index: 0, kind: input, shape index: {}]   ;;  %s121_s1 = inlined_call_operand.vmem [shape: f32[8,256], index: 1, kind: input, shape index: {}]   ;;  %s122_s2 = inlined_call_operand.vmem [shape: f32[1,8,128], index: 2, kind: output, shape index: {}]  }
   0x1   :  { %v60_v0 = vld [vmem:[%s120_s0] sm:$0xff]  ;;  %v65_v2 = vld [vmem:[%s120_s0 + $0x8] sm:$0xff] }
   0x2   :  { %v61_v1 = vld [vmem:[%s121_s1] sm:$0xff]  ;;  %v66_v4 = vld [vmem:[%s121_s1 + $0x8] sm:$0xff] }
   0x3   :  { %v62_v3 = vsub.f32 %v60_v0, %v61_v1  ;;  %v67_v5 = vsub.f32 %v65_v2, %v66_v4 }
   0x5   :  { %v63_v6 = vmul.f32 %v62_v3, %v62_v3  ;;  %v68_v7 = vmul.f32 %v67_v5, %v67_v5 }
   0x7   :  { %v69_v8 = vadd.f32 %v68_v7, %v63_v6 }
   0x9   :  { %72 = vst [vmem:[%s122_s2] sm:$0xff] %v69_v8 }

</bundles_post_ra>
